<compile_context>
chip_gen: v7x
topology: tpu7x:2x2x1
jax: 0.10.0
libtpu: 0.0.40
codegen_flags: <defaults>
</compile_context>

<pallas_src>
import functools

import jax
import jax.numpy as jnp
from jax.experimental import pallas as pl
from jax.experimental.pallas import tpu as pltpu


# -----------------------------------------------------------------------------
# Small helpers
# -----------------------------------------------------------------------------
def _round_up(x, m):
    return ((x + m - 1) // m) * m


def _largest_divisor(n, cap, mult=1):
    """Largest d <= cap with n % d == 0 and d % mult == 0 (assumes mult | n)."""
    best = mult
    d = 1
    while d * d <= n:
        if n % d == 0:
            for cand in (d, n // d):
                if cand <= cap and cand % mult == 0 and cand > best:
                    best = cand
        d += 1
    return best


def _pad_gate_cols(w, H, Hp):
    """[..., 4H] -> [..., 4Hp], keeping PyTorch gate order (i, f, g, o)."""
    lead = w.shape[:-1]
    w4 = w.reshape(lead + (4, H))
    out = jnp.zeros(lead + (4, Hp), jnp.float32).at[..., :H].set(w4)
    return out.reshape(lead + (4 * Hp,))


def _pad_rows(w, rows_to):
    return jnp.pad(w, ((0, rows_to - w.shape[0]), (0, 0)))


# -----------------------------------------------------------------------------
# Pallas kernels
# -----------------------------------------------------------------------------
def _proj_l0_kernel(x_ref, wf_ref, wb_ref, bf_ref, bb_ref, gf_ref, gb_ref):
    """Hoisted input projection (layer 0): one x row-tile, both directions."""
    x = x_ref[...]
    gf_ref[...] = (jnp.dot(x, wf_ref[...], preferred_element_type=jnp.float32)
                   + bf_ref[...])
    gb_ref[...] = (jnp.dot(x, wb_ref[...], preferred_element_type=jnp.float32)
                   + bb_ref[...])


def _proj_bi_kernel(xf_ref, xb_ref, wff_ref, wfb_ref, wbf_ref, wbb_ref,
                    bf_ref, bb_ref, gf_ref, gb_ref):
    """Hoisted input projection for layers >= 1.

    Input is the previous layer's (y_fwd, y_bwd); the concatenated matmul is
    expressed as xf @ W[:H] + xb @ W[H:], so concat([y_f, y_b]) never hits HBM.
    """
    xf = xf_ref[...]
    xb = xb_ref[...]
    gf_ref[...] = (jnp.dot(xf, wff_ref[...], preferred_element_type=jnp.float32)
                   + jnp.dot(xb, wfb_ref[...], preferred_element_type=jnp.float32)
                   + bf_ref[...])
    gb_ref[...] = (jnp.dot(xf, wbf_ref[...], preferred_element_type=jnp.float32)
                   + jnp.dot(xb, wbb_ref[...], preferred_element_type=jnp.float32)
                   + bb_ref[...])


def _bilstm_kernel(gxf_ref, gxb_ref, whhf_ref, whhb_ref,
                   yf_ref, yb_ref, hn_ref, cn_ref,
                   hf_s, cf_s, hb_s, cb_s, *, unroll):
    """Fused bidirectional LSTM recurrence over one time chunk.

    gxf_ref : [Tt, Bp, 4Hp]  precomputed x-gates, forward chunk c
    gxb_ref : [Tt, Bp, 4Hp]  precomputed x-gates, backward chunk (nc-1-c)
    whh*    : [Hp, 4Hp]      recurrent weights (transposed, gate-padded)
    yf_ref  : [Tt, Bp, Hp]   forward hidden outputs (chunk c)
    yb_ref  : [Tt, Bp, Hp]   backward hidden outputs (chunk nc-1-c)
    hn/cn   : [Bp, 2Hp]      final (h, c), [fwd | bwd]
    h*/c*_s : VMEM scratch [Bp, Hp] carried across the time-chunk grid.
    """
    Tt = gxf_ref.shape[0]
    Hp = hf_s.shape[1]

    @pl.when(pl.program_id(0) == 0)
    def _():
        hf_s[...] = jnp.zeros_like(hf_s)
        cf_s[...] = jnp.zeros_like(cf_s)
        hb_s[...] = jnp.zeros_like(hb_s)
        cb_s[...] = jnp.zeros_like(cb_s)

    # Loop-invariant: load recurrent weights once per grid step.
    whh_f = whhf_ref[...]
    whh_b = whhb_ref[...]

    def lstm_cell(gates, c_prev):
        i_g = jax.nn.sigmoid(gates[:, 0 * Hp:1 * Hp])
        f_g = jax.nn.sigmoid(gates[:, 1 * Hp:2 * Hp])
        g_g = jnp.tanh(gates[:, 2 * Hp:3 * Hp])
        o_g = jax.nn.sigmoid(gates[:, 3 * Hp:4 * Hp])
        c_new = f_g * c_prev + i_g * g_g
        h_new = o_g * jnp.tanh(c_new)
        return h_new, c_new

    def step(j, carry):
        tf = j              # forward local time
        tb = Tt - 1 - j     # backward local time (chunk order reversed by index_map)
        gf = gxf_ref[tf] + jnp.dot(hf_s[...], whh_f,
                                   preferred_element_type=jnp.float32)
        gb = gxb_ref[tb] + jnp.dot(hb_s[...], whh_b,
                                   preferred_element_type=jnp.float32)
        hf, cf = lstm_cell(gf, cf_s[...])
        hb, cb = lstm_cell(gb, cb_s[...])
        hf_s[...] = hf
        cf_s[...] = cf
        hb_s[...] = hb
        cb_s[...] = cb
        yf_ref[tf] = hf
        yb_ref[tb] = hb
        return carry

    jax.lax.fori_loop(0, Tt, step, 0, unroll=unroll)

    # Final states: last grid step's write is the one that reaches HBM.
    hn_ref[:, :Hp] = hf_s[...]
    hn_ref[:, Hp:] = hb_s[...]
    cn_ref[:, :Hp] = cf_s[...]
    cn_ref[:, Hp:] = cb_s[...]


def _layer_norm_kernel(yf_ref, yb_ref, gf_ref, gb_ref, bf_ref, bb_ref, o_ref,
                       *, h_valid, eps):
    """LayerNorm over concat([y_fwd, y_bwd], -1), masked to real features."""
    Hp = yf_ref.shape[-1]
    yf = yf_ref[...]
    yb = yb_ref[...]
    col = jax.lax.broadcasted_iota(jnp.int32, (1, Hp), 1)
    mask = (col < h_valid).astype(jnp.float32)
    inv_n = 1.0 / (2.0 * h_valid)
    s = (jnp.sum(yf * mask, axis=-1, keepdims=True)
         + jnp.sum(yb * mask, axis=-1, keepdims=True))
    mu = s * inv_n
    df = (yf - mu) * mask
    db = (yb - mu) * mask
    var = (jnp.sum(df * df, axis=-1, keepdims=True)
           + jnp.sum(db * db, axis=-1, keepdims=True)) * inv_n
    inv = jax.lax.rsqrt(var + eps)
    o_ref[:, :Hp] = df * inv * gf_ref[...] + bf_ref[...]
    o_ref[:, Hp:] = db * inv * gb_ref[...] + bb_ref[...]


# -----------------------------------------------------------------------------
# Wrappers (pallas_call plumbing)
# -----------------------------------------------------------------------------
def _input_proj_layer0(x_rows, wf, wb, bf, bb, Hp):
    rows, E = x_rows.shape
    rt = _largest_divisor(rows, 512, mult=8)
    grid = (rows // rt,)
    return pl.pallas_call(
        _proj_l0_kernel,
        grid=grid,
        in_specs=[
            pl.BlockSpec((rt, E), lambda r: (r, 0)),
            pl.BlockSpec((E, 4 * Hp), lambda r: (0, 0)),
            pl.BlockSpec((E, 4 * Hp), lambda r: (0, 0)),
            pl.BlockSpec((1, 4 * Hp), lambda r: (0, 0)),
            pl.BlockSpec((1, 4 * Hp), lambda r: (0, 0)),
        ],
        out_specs=[
            pl.BlockSpec((rt, 4 * Hp), lambda r: (r, 0)),
            pl.BlockSpec((rt, 4 * Hp), lambda r: (r, 0)),
        ],
        out_shape=(
            jax.ShapeDtypeStruct((rows, 4 * Hp), jnp.float32),
            jax.ShapeDtypeStruct((rows, 4 * Hp), jnp.float32),
        ),
        compiler_params=pltpu.CompilerParams(
            dimension_semantics=("parallel",)),
    )(x_rows, wf, wb, bf, bb)


def _input_proj_bi(yf_rows, yb_rows, wff, wfb, wbf, wbb, bf, bb, Hp):
    rows = yf_rows.shape[0]
    rt = _largest_divisor(rows, 512, mult=8)
    grid = (rows // rt,)
    return pl.pallas_call(
        _proj_bi_kernel,
        grid=grid,
        in_specs=[
            pl.BlockSpec((rt, Hp), lambda r: (r, 0)),
            pl.BlockSpec((rt, Hp), lambda r: (r, 0)),
            pl.BlockSpec((Hp, 4 * Hp), lambda r: (0, 0)),
            pl.BlockSpec((Hp, 4 * Hp), lambda r: (0, 0)),
            pl.BlockSpec((Hp, 4 * Hp), lambda r: (0, 0)),
            pl.BlockSpec((Hp, 4 * Hp), lambda r: (0, 0)),
            pl.BlockSpec((1, 4 * Hp), lambda r: (0, 0)),
            pl.BlockSpec((1, 4 * Hp), lambda r: (0, 0)),
        ],
        out_specs=[
            pl.BlockSpec((rt, 4 * Hp), lambda r: (r, 0)),
            pl.BlockSpec((rt, 4 * Hp), lambda r: (r, 0)),
        ],
        out_shape=(
            jax.ShapeDtypeStruct((rows, 4 * Hp), jnp.float32),
            jax.ShapeDtypeStruct((rows, 4 * Hp), jnp.float32),
        ),
        compiler_params=pltpu.CompilerParams(
            dimension_semantics=("parallel",)),
    )(yf_rows, yb_rows, wff, wfb, wbf, wbb, bf, bb)


def _bilstm_layer(gf, gb, whh_f, whh_b, Bp, Hp, max_time_chunk=64):
    T = gf.shape[0]
    Tt = _largest_divisor(T, max_time_chunk, mult=1)
    nc = T // Tt
    kernel = functools.partial(_bilstm_kernel, unroll=2)
    return pl.pallas_call(
        kernel,
        grid=(nc,),
        in_specs=[
            pl.BlockSpec((Tt, Bp, 4 * Hp), lambda c: (c, 0, 0)),
            pl.BlockSpec((Tt, Bp, 4 * Hp), lambda c: (nc - 1 - c, 0, 0)),
            pl.BlockSpec((Hp, 4 * Hp), lambda c: (0, 0)),
            pl.BlockSpec((Hp, 4 * Hp), lambda c: (0, 0)),
        ],
        out_specs=[
            pl.BlockSpec((Tt, Bp, Hp), lambda c: (c, 0, 0)),
            pl.BlockSpec((Tt, Bp, Hp), lambda c: (nc - 1 - c, 0, 0)),
            pl.BlockSpec((Bp, 2 * Hp), lambda c: (0, 0)),
            pl.BlockSpec((Bp, 2 * Hp), lambda c: (0, 0)),
        ],
        out_shape=(
            jax.ShapeDtypeStruct((T, Bp, Hp), jnp.float32),
            jax.ShapeDtypeStruct((T, Bp, Hp), jnp.float32),
            jax.ShapeDtypeStruct((Bp, 2 * Hp), jnp.float32),
            jax.ShapeDtypeStruct((Bp, 2 * Hp), jnp.float32),
        ),
        scratch_shapes=[pltpu.VMEM((Bp, Hp), jnp.float32)] * 4,
        compiler_params=pltpu.CompilerParams(
            dimension_semantics=("arbitrary",)),
    )(gf, gb, whh_f, whh_b)


def _layer_norm(yf_rows, yb_rows, gamma, beta, H, Hp, eps=1e-5):
    rows = yf_rows.shape[0]
    rt = _largest_divisor(rows, 1024, mult=8)
    grid = (rows // rt,)

    def pad_half(v):
        return jnp.zeros((1, Hp), jnp.float32).at[0, :H].set(v)

    gf, gb = pad_half(gamma[:H]), pad_half(gamma[H:])
    bf, bb = pad_half(beta[:H]), pad_half(beta[H:])
    kernel = functools.partial(_layer_norm_kernel, h_valid=H, eps=eps)
    return pl.pallas_call(
        kernel,
        grid=grid,
        in_specs=[
            pl.BlockSpec((rt, Hp), lambda r: (r, 0)),
            pl.BlockSpec((rt, Hp), lambda r: (r, 0)),
            pl.BlockSpec((1, Hp), lambda r: (0, 0)),
            pl.BlockSpec((1, Hp), lambda r: (0, 0)),
            pl.BlockSpec((1, Hp), lambda r: (0, 0)),
            pl.BlockSpec((1, Hp), lambda r: (0, 0)),
        ],
        out_specs=pl.BlockSpec((rt, 2 * Hp), lambda r: (r, 0)),
        out_shape=jax.ShapeDtypeStruct((rows, 2 * Hp), jnp.float32),
        compiler_params=pltpu.CompilerParams(
            dimension_semantics=("parallel",)),
    )(yf_rows, yb_rows, gf, gb, bf, bb)


# -----------------------------------------------------------------------------
# Parameter packing / init / forward
# -----------------------------------------------------------------------------
def _pack_direction(weights, H, Hp, layer):
    """Zero-pad one direction's PyTorch LSTM weights to (8,128)-aligned shapes.

    Zero padding keeps the padded hidden channels exactly 0 through the
    recurrence (sigmoid(0)*tanh(0) == 0), so results on real channels match
    the unpadded computation bit-for-bit in structure.
    """
    w_ih, w_hh, b_ih, b_hh = weights
    w_ih = jnp.asarray(w_ih, jnp.float32)
    w_hh = jnp.asarray(w_hh, jnp.float32)
    bias = jnp.asarray(b_ih + b_hh, jnp.float32)

    out = {}
    w_ih_t = _pad_gate_cols(w_ih.T, H, Hp)                 # [Din, 4Hp]
    if layer == 0:
        out["w_in"] = w_ih_t                               # Din = embedding_dim
    else:
        # Din = 2H: split into parts multiplying y_fwd / y_bwd of the previous
        # layer; rows for padded input channels are zero.
        out["w_in_f"] = _pad_rows(w_ih_t[:H], Hp)          # [Hp, 4Hp]
        out["w_in_b"] = _pad_rows(w_ih_t[H:], Hp)          # [Hp, 4Hp]
    out["w_hh"] = _pad_rows(_pad_gate_cols(w_hh.T, H, Hp), Hp)   # [Hp, 4Hp]
    out["bias"] = _pad_gate_cols(bias, H, Hp).reshape(1, 4 * Hp)
    return out


def init_params(key, vocab_size, embedding_dim, hidden_dim, num_layers):
    H = hidden_dim // 2
    params = {}
    key, k_emb = jax.random.split(key)
    params["embedding"] = jax.random.normal(
        k_emb, (vocab_size, embedding_dim), jnp.float32)

    k_init = 1.0 / jnp.sqrt(jnp.float32(H))
    lstm = []
    for layer in range(num_layers):
        din = embedding_dim if layer == 0 else hidden_dim
        layer_params = {}
        for direction in ("fwd", "bwd"):
            keys = jax.random.split(key, 5)
            key = keys[0]
            w_ih = jax.random.uniform(keys[1], (4 * H, din), jnp.float32,
                                      -k_init, k_init)
            w_hh = jax.random.uniform(keys[2], (4 * H, H), jnp.float32,
                                      -k_init, k_init)
            b_ih = jax.random.uniform(keys[3], (4 * H,), jnp.float32,
                                      -k_init, k_init)
            b_hh = jax.random.uniform(keys[4], (4 * H,), jnp.float32,
                                      -k_init, k_init)
            layer_params[direction] = (w_ih, w_hh, b_ih, b_hh)
        lstm.append(layer_params)
    params["lstm"] = lstm
    # PyTorch LayerNorm default init: weight=1, bias=0.
    params["ln_gamma"] = jnp.ones((hidden_dim,), jnp.float32)
    params["ln_beta"] = jnp.zeros((hidden_dim,), jnp.float32)
    return params


def enhanced_lstm_encoder_forward(params, src, num_layers):
    """Matches EnhancedLSTMEncoder.forward (eval mode).

    src: int32 [B, T] token ids.
    Returns: outputs [B, T, hidden_dim],
             (hidden [num_layers, B, hidden_dim], cell [num_layers, B, hidden_dim]).
    """
    B, T = src.shape
    H = params["lstm"][0]["fwd"][1].shape[1]            # W_hh: [4H, H]
    Hp = _round_up(H, 128)                              # lane-aligned hidden
    Bp = _round_up(B, 8)                                # sublane-aligned batch

    emb = jnp.take(params["embedding"], src, axis=0)    # [B, T, E]
    # dropout(embedded): identity in eval mode.
    x = jnp.transpose(emb, (1, 0, 2)).astype(jnp.float32)   # time-major [T, B, E]
    x = jnp.pad(x, ((0, 0), (0, Bp - B), (0, 0)))            # [T, Bp, E]
    E = x.shape[-1]
    rows = T * Bp

    hs, cs = [], []
    yf = yb = None
    for layer in range(num_layers):
        pf = _pack_direction(params["lstm"][layer]["fwd"], H, Hp, layer)
        pb = _pack_direction(params["lstm"][layer]["bwd"], H, Hp, layer)

        if layer == 0:
            gf, gb = _input_proj_layer0(
                x.reshape(rows, E), pf["w_in"], pb["w_in"],
                pf["bias"], pb["bias"], Hp)
        else:
            gf, gb = _input_proj_bi(
                yf.reshape(rows, Hp), yb.reshape(rows, Hp),
                pf["w_in_f"], pf["w_in_b"], pb["w_in_f"], pb["w_in_b"],
                pf["bias"], pb["bias"], Hp)

        yf, yb, hn, cn = _bilstm_layer(
            gf.reshape(T, Bp, 4 * Hp), gb.reshape(T, Bp, 4 * Hp),
            pf["w_hh"], pb["w_hh"], Bp, Hp)

        hs.append(jnp.concatenate([hn[:B, :H], hn[:B, Hp:Hp + H]], axis=-1))
        cs.append(jnp.concatenate([cn[:B, :H], cn[:B, Hp:Hp + H]], axis=-1))
        # inter-layer dropout: identity in eval mode.

    ln = _layer_norm(yf.reshape(rows, Hp), yb.reshape(rows, Hp),
                     params["ln_gamma"], params["ln_beta"], H, Hp)
    ln = ln.reshape(T, Bp, 2 * Hp)
    outputs = jnp.concatenate(
        [ln[:, :B, :H], ln[:, :B, Hp:Hp + H]], axis=-1)      # [T, B, 2H]
    outputs = jnp.transpose(outputs, (1, 0, 2))              # [B, T, 2H]

    hidden = jnp.stack(hs, axis=0)                           # [num_layers, B, 2H]
    cell = jnp.stack(cs, axis=0)                             # [num_layers, B, 2H]
    return outputs, (hidden, cell)


if __name__ == "__main__":
    vocab_size = 50
    embedding_dim = 16
    hidden_dim = 32        # per-direction H = 16
    num_layers = 2
    B, T = 2, 8

    key = jax.random.PRNGKey(0)
    key, k_src, k_par = jax.random.split(key, 3)
    src = jax.random.randint(k_src, (B, T), 0, vocab_size, dtype=jnp.int32)
    params = init_params(k_par, vocab_size, embedding_dim, hidden_dim, num_layers)

    outputs, (hidden, cell) = enhanced_lstm_encoder_forward(params, src, num_layers)
    jax.block_until_ready((outputs, hidden, cell))

    assert outputs.shape == (B, T, hidden_dim)
    assert hidden.shape == (num_layers, B, hidden_dim)
    assert cell.shape == (num_layers, B, hidden_dim)
    assert bool(jnp.all(jnp.isfinite(outputs)))
    print("KERNEL_OK")
</pallas_src>

<mosaic_0001>
module attributes {stable_mosaic.version = 11 : i64} {
  func.func @_proj_l0_kernel(%arg0: i32, %arg1: memref<64x16xf32, #tpu.memory_space<vmem>>, %arg2: memref<16x512xf32, #tpu.memory_space<vmem>>, %arg3: memref<16x512xf32, #tpu.memory_space<vmem>>, %arg4: memref<1x512xf32, #tpu.memory_space<vmem>>, %arg5: memref<1x512xf32, #tpu.memory_space<vmem>>, %arg6: memref<64x512xf32, #tpu.memory_space<vmem>>, %arg7: memref<64x512xf32, #tpu.memory_space<vmem>>) attributes {dimension_semantics = [#tpu.dimension_semantics<parallel>], iteration_bounds = array<i64: 1>, scalar_prefetch = 0 : i64, scratch_operands = 0 : i64, tpu.core_type = #tpu.core_type<tc>, window_params = [{transform_indices = @transform_0, window_bounds = array<i64: 64, 16>}, {pipeline_mode = #tpu.pipeline_mode<synchronous>, transform_indices = @transform_1, window_bounds = array<i64: 16, 512>}, {pipeline_mode = #tpu.pipeline_mode<synchronous>, transform_indices = @transform_2, window_bounds = array<i64: 16, 512>}, {pipeline_mode = #tpu.pipeline_mode<synchronous>, transform_indices = @transform_3, window_bounds = array<i64: 1, 512>}, {pipeline_mode = #tpu.pipeline_mode<synchronous>, transform_indices = @transform_4, window_bounds = array<i64: 1, 512>}, {transform_indices = @transform_5, window_bounds = array<i64: 64, 512>}, {transform_indices = @transform_6, window_bounds = array<i64: 64, 512>}]} {
    %c0 = arith.constant 0 : index
    %c0_0 = arith.constant 0 : index
    %0 = vector.load %arg1[%c0, %c0_0] : memref<64x16xf32, #tpu.memory_space<vmem>>, vector<64x16xf32>
    %c0_1 = arith.constant 0 : index
    %c0_2 = arith.constant 0 : index
    %1 = vector.load %arg2[%c0_1, %c0_2] : memref<16x512xf32, #tpu.memory_space<vmem>>, vector<16x512xf32>
    %cst = arith.constant dense<0.000000e+00> : vector<64x512xf32>
    %2 = tpu.matmul %0, %1, %cst {dimension_numbers = #tpu.dot_dimension_numbers<[1], [0], [0], [1], [0, 0, 1, 1], [], []>} : vector<64x16xf32>, vector<16x512xf32>, vector<64x512xf32> -> vector<64x512xf32>
    %c0_3 = arith.constant 0 : index
    %c0_4 = arith.constant 0 : index
    %3 = vector.load %arg4[%c0_3, %c0_4] : memref<1x512xf32, #tpu.memory_space<vmem>>, vector<1x512xf32>
    %4 = vector.broadcast %3 : vector<1x512xf32> to vector<64x512xf32>
    %5 = arith.addf %2, %4 : vector<64x512xf32>
    %c0_5 = arith.constant 0 : index
    %c0_6 = arith.constant 0 : index
    %6 = vector.load %arg6[%c0_5, %c0_6] : memref<64x512xf32, #tpu.memory_space<vmem>>, vector<64x512xf32>
    tpu.vector_store %arg6[%c0_5, %c0_6], %5 {strides = array<i32>} : memref<64x512xf32, #tpu.memory_space<vmem>>, vector<64x512xf32>,
    %c0_7 = arith.constant 0 : index
    %c0_8 = arith.constant 0 : index
    %7 = vector.load %arg3[%c0_7, %c0_8] : memref<16x512xf32, #tpu.memory_space<vmem>>, vector<16x512xf32>
    %cst_9 = arith.constant dense<0.000000e+00> : vector<64x512xf32>
    %8 = tpu.matmul %0, %7, %cst_9 {dimension_numbers = #tpu.dot_dimension_numbers<[1], [0], [0], [1], [0, 0, 1, 1], [], []>} : vector<64x16xf32>, vector<16x512xf32>, vector<64x512xf32> -> vector<64x512xf32>
    %c0_10 = arith.constant 0 : index
    %c0_11 = arith.constant 0 : index
    %9 = vector.load %arg5[%c0_10, %c0_11] : memref<1x512xf32, #tpu.memory_space<vmem>>, vector<1x512xf32>
    %10 = vector.broadcast %9 : vector<1x512xf32> to vector<64x512xf32>
    %11 = arith.addf %8, %10 : vector<64x512xf32>
    %c0_12 = arith.constant 0 : index
    %c0_13 = arith.constant 0 : index
    %12 = vector.load %arg7[%c0_12, %c0_13] : memref<64x512xf32, #tpu.memory_space<vmem>>, vector<64x512xf32>
    tpu.vector_store %arg7[%c0_12, %c0_13], %11 {strides = array<i32>} : memref<64x512xf32, #tpu.memory_space<vmem>>, vector<64x512xf32>,
    return
  }
  func.func @transform_0(%arg0: i32) -> (i32, i32) {
    %c0_i32 = arith.constant 0 : i32
    %c0_i32_0 = arith.constant 0 : i32
    return %arg0, %c0_i32 : i32, i32
  }
  func.func @transform_1(%arg0: i32) -> (i32, i32) {
    %c0_i32 = arith.constant 0 : i32
    %c0_i32_0 = arith.constant 0 : i32
    %c0_i32_1 = arith.constant 0 : i32
    return %c0_i32, %c0_i32_0 : i32, i32
  }
  func.func @transform_2(%arg0: i32) -> (i32, i32) {
    %c0_i32 = arith.constant 0 : i32
    %c0_i32_0 = arith.constant 0 : i32
    %c0_i32_1 = arith.constant 0 : i32
    return %c0_i32, %c0_i32_0 : i32, i32
  }
  func.func @transform_3(%arg0: i32) -> (i32, i32) {
    %c0_i32 = arith.constant 0 : i32
    %c0_i32_0 = arith.constant 0 : i32
    %c0_i32_1 = arith.constant 0 : i32
    return %c0_i32, %c0_i32_0 : i32, i32
  }
  func.func @transform_4(%arg0: i32) -> (i32, i32) {
    %c0_i32 = arith.constant 0 : i32
    %c0_i32_0 = arith.constant 0 : i32
    %c0_i32_1 = arith.constant 0 : i32
    return %c0_i32, %c0_i32_0 : i32, i32
  }
  func.func @transform_5(%arg0: i32) -> (i32, i32) {
    %c0_i32 = arith.constant 0 : i32
    %c0_i32_0 = arith.constant 0 : i32
    return %arg0, %c0_i32 : i32, i32
  }
  func.func @transform_6(%arg0: i32) -> (i32, i32) {
    %c0_i32 = arith.constant 0 : i32
    %c0_i32_0 = arith.constant 0 : i32
    return %arg0, %c0_i32 : i32, i32
  }
}

</mosaic_0001>

<bundles_post_ra>
// kernel: tpu_custom_call.1
= control target key start
LH: loop header
LB: loop body
LE: loop exit
PB: predicated region body
PF: predicated region fallthrough
CT: control target
= control target key end

     0   :  { %12 = vsyncpa [#allocation3], 0  ;;  %s1118_s0 = inlined_call_operand.vmem [shape: f32[64,16], index: 0, kind: input, shape index: {}]   ;;  %s1119_s1 = inlined_call_operand.vmem [shape: f32[16,512], index: 1, kind: input, shape index: {}]   ;;  %s1120_s2 = inlined_call_operand.hbm [shape: f32[16,512], index: 2, kind: input, shape index: {}]   ;;  %s1121_s3 = inlined_call_operand.vmem [shape: f32[1,512], index: 3, kind: input, shape index: {}]   ;;  %s1122_s4 = inlined_call_operand.vmem [shape: f32[1,512], index: 4, kind: input, shape index: {}]   ;;  %s1123_s5 = inlined_call_operand.hbm [shape: f32[64,512], index: 5, kind: output, shape index: {0}]   ;;  %s1124_s6 = inlined_call_operand.hbm [shape: f32[64,512], index: 6, kind: output, shape index: {1}]  }
   0x1   :  { %13 = vsyncpa [#allocation4], 0 }
   0x2   :  { %14 = vsyncpa [#allocation7], 0  ;;  %s806_s21 = smov [#allocation2]   ;;  %s734_s25 = scalar_lea.hbm %s1120_s2, 1024 }
   0x3   :  { %s24_s22 = sshll.u32 %s806_s21, 4  ;;  %p735_p0 = scmp.ne.s32.totalorder %s1120_s2, %s734_s25  ;;  %s25_s22 = int_to_ptr.vmem [resolvable:$true] %s24_s22 }
   0x4   :  { %p738_p1 = scmp.lt.u32.totalorder %s734_s25, %s1120_s2 }
   0x6   :  { %p740_p2 = pnand %p738_p1, %p735_p0 }
   0x8   :  { %743 = shalt.err (!%p740_p2)
}
   0x9   :  { %s744_s30 = scalar_lea.vmem %s25_s22, 1024  ;;  %p749_p4 = scmp.lt.s32.totalorder %s25_s22, %s25_s22 }
   0xa   :  { %p745_p3 = scmp.ne.s32.totalorder %s25_s22, %s744_s30  ;;  %p750_p5 = scmp.lt.s32.totalorder %s744_s30, %s744_s30 }
   0xc   :  { %p751_p6 = por %p750_p5, %p749_p4 }
   0xe   :  { %p752_p7 = pnand %p751_p6, %p745_p3 }
  0x10   :  { %755 = shalt.err (!%p752_p7)
}
  0x11   :  { %s807_s7 = smov 512   ;;  %s808_s8 = smov 32  }
  0x12   :  { %30 = dma.hbm_to_vmem [thread:$0]  %s1120_s2, 1024, %s25_s22, [#allocation3], %s807_s7, %s807_s7, %s808_s8  }
  0x13   :  { %800 = dma.done.wait [#allocation3], 1024  }
  0x14   :  { %801 = vsyncadd [#allocation3], 4294966272  ;;  %v809_v0 = vmov 0.0   ;;  %v47_v1 = vld [vmem:[%s1119_s1 + $0x8] sm:$0xff]  ;;  %v49_v3 = vld [vmem:[%s1119_s1 + $0x18] sm:$0xff]  ;;  %vm76_vm0 = vcmask 130048   ;;  %v56_v33 = vlaneseq }
  0x15   :  { %165 = vmatprep.mubr.f32.mxu0 %v809_v0  ;;  %278 = vmatprep.mubr.f32.mxu1 %v809_v0  ;;  %v51_v2 = vld [vmem:[%s1119_s1 + $0x28] sm:$0xff]  ;;  %v53_v5 = vld [vmem:[%s1119_s1 + $0x38] sm:$0xff]  ;;  %v46_v6 = vld [vmem:[%s1119_s1] sm:$0xff]  ;;  %s810_s20 = smov [#allocation5]  }
  0x16   :  { %v712_v4 = vpack.c.bf16 %v51_v2, %v47_v1  ;;  %v50_v7 = vld [vmem:[%s1119_s1 + $0x20] sm:$0xff]  ;;  %v716_v8 = vpack.c.bf16 %v53_v5, %v49_v3  ;;  %v48_v10 = vld [vmem:[%s1119_s1 + $0x10] sm:$0xff]  ;;  %v360_v14 = vld [vmem:[#allocation2 + $0x8] sm:$0xff]  ;;  %v980_v34 = vshrl.u32 %v56_v33, 7  ;;  %s652_s21 = sshll.u32 %s810_s20, 4  ;;  %s653_s21 = int_to_ptr.vmem [resolvable:$true] %s652_s21 }
  0x17   :  { %v714_v9 = vpack.c.bf16 %v50_v7, %v46_v6  ;;  %v52_v11 = vld [vmem:[%s1119_s1 + $0x30] sm:$0xff]  ;;  %v891_v12 = vld [vmem:[%s1118_s0] sm:$0xff]  ;;  %v364_v15 = vld [vmem:[#allocation2 + $0x28] sm:$0xff]  ;;  %p761_p9 = scmp.lt.s32.totalorder %s653_s21, %s653_s21 }
  0x18   :  { %713 = vmatprep.subr.bf16.mxu0 %v712_v4  ;;  %v718_v13 = vpack.c.bf16 %v52_v11, %v48_v10  ;;  %v362_v16 = vld [vmem:[#allocation2 + $0x18] sm:$0xff]  ;;  %717 = vmatprep.subr.bf16.mxu1 %v716_v8  ;;  %v720_v17 = vpack.c.bf16 %v364_v15, %v360_v14  ;;  %v359_v19 = vld [vmem:[#allocation2] sm:$0xff]  ;;  %v361_v23 = vld [vmem:[#allocation2 + $0x10] sm:$0xff]  ;;  %v58_v35 = vsub.s32 0, %v980_v34  ;;  %v66_v37 = vsub.s32 2, %v980_v34 }
  0x19   :  { %715 = vmatpush1.bf16.msra.mxu0 %v714_v9  ;;  %v366_v18 = vld [vmem:[#allocation2 + $0x38] sm:$0xff]  ;;  %v363_v20 = vld [vmem:[#allocation2 + $0x20] sm:$0xff]  ;;  %v365_v24 = vld [vmem:[#allocation2 + $0x30] sm:$0xff]  ;;  %v62_v38 = vsub.s32 1, %v980_v34  ;;  %v70_v39 = vsub.s32 3, %v980_v34 }
  0x1a   :  { %719 = vmatpush1.bf16.msra.mxu1 %v718_v13  ;;  %v724_v21 = vpack.c.bf16 %v366_v18, %v362_v16  ;;  %v722_v22 = vpack.c.bf16 %v363_v20, %v359_v19  ;;  %721 = vmatprep.subr.bf16.mxu0 %v720_v17  ;;  %v726_v25 = vpack.c.bf16 %v365_v24, %v361_v23  ;;  %v39_v26 = vld [vmem:[%s1118_s0 + $0x8] sm:$0xff]  ;;  %v40_v27 = vld [vmem:[%s1118_s0 + $0x10] sm:$0xff]  ;;  %v41_v28 = vld [vmem:[%s1118_s0 + $0x18] sm:$0xff] }
  0x1b   :  { %v42_v29 = vld [vmem:[%s1118_s0 + $0x20] sm:$0xff]  ;;  %v43_v30 = vld [vmem:[%s1118_s0 + $0x28] sm:$0xff]  ;;  %v44_v31 = vld [vmem:[%s1118_s0 + $0x30] sm:$0xff] }
  0x1c   :  { %680 = vmatmul.mubr.msk.f32.vlgmr.msra.gmra.mrb[0].mxu0 %vm76_vm0, %v891_v12  ;;  %725 = vmatprep.subr.bf16.mxu1 %v724_v21  ;;  %v45_v32 = vld [vmem:[%s1118_s0 + $0x38] sm:$0xff]  ;;  %v54_v36 = vld [vmem:[%s1121_s3] sm:$0xf] }
  0x1d   :  { %688 = vmatmul.mubr.msk.f32.vlgmr.msra.gmra.mrb[0].mxu1 %vm76_vm0, %v891_v12  ;;  %723 = vmatpush1.bf16.msra.mxu0 %v722_v22  ;;  %v991_v40 = vrot.slane %v54_v36, %v58_v35  ;;  %v995_v41 = vrot.slane %v54_v36, %v66_v37  ;;  %v999_v42 = vrot.slane %v54_v36, %v62_v38 }
  0x1e   :  { %727 = vmatpush1.bf16.msra.mxu1 %v726_v25  ;;  %171 = vmatprep.mubr.f32.mxu0 %v809_v0  ;;  %v1003_v43 = vrot.slane %v54_v36, %v70_v39 }
  0x1f   :  { %284 = vmatprep.mubr.f32.mxu1 %v809_v0 }
  0x20   :  { %681 = vmatmul.mubr.msk.f32.gmra.mrb[2].mxu0 %vm76_vm0, %v39_v26 }
  0x21   :  { %689 = vmatmul.mubr.msk.f32.gmra.mrb[2].mxu1 %vm76_vm0, %v39_v26  ;;  %177 = vmatprep.mubr.f32.mxu0 %v809_v0 }
  0x22   :  { %290 = vmatprep.mubr.f32.mxu1 %v809_v0 }
  0x24   :  { %682 = vmatmul.mubr.msk.f32.gmra.mrb[4].mxu0 %vm76_vm0, %v40_v27 }
  0x25   :  { %690 = vmatmul.mubr.msk.f32.gmra.mrb[4].mxu1 %vm76_vm0, %v40_v27  ;;  %183 = vmatprep.mubr.f32.mxu0 %v809_v0 }
  0x26   :  { %296 = vmatprep.mubr.f32.mxu1 %v809_v0 }
  0x28   :  { %683 = vmatmul.mubr.msk.f32.gmra.mrb[6].mxu0 %vm76_vm0, %v41_v28 }
  0x29   :  { %691 = vmatmul.mubr.msk.f32.gmra.mrb[6].mxu1 %vm76_vm0, %v41_v28  ;;  %189 = vmatprep.mubr.f32.mxu0 %v809_v0 }
  0x2a   :  { %302 = vmatprep.mubr.f32.mxu1 %v809_v0 }
  0x2c   :  { %684 = vmatmul.mubr.msk.f32.gmra.mrb[8].mxu0 %vm76_vm0, %v42_v29 }
  0x2d   :  { %692 = vmatmul.mubr.msk.f32.gmra.mrb[8].mxu1 %vm76_vm0, %v42_v29  ;;  %195 = vmatprep.mubr.f32.mxu0 %v809_v0 }
  0x2e   :  { %308 = vmatprep.mubr.f32.mxu1 %v809_v0 }
  0x30   :  { %685 = vmatmul.mubr.msk.f32.gmra.mrb[10].mxu0 %vm76_vm0, %v43_v30 }
  0x31   :  { %693 = vmatmul.mubr.msk.f32.gmra.mrb[10].mxu1 %vm76_vm0, %v43_v30  ;;  %201 = vmatprep.mubr.f32.mxu0 %v809_v0 }
  0x32   :  { %314 = vmatprep.mubr.f32.mxu1 %v809_v0 }
  0x34   :  { %686 = vmatmul.mubr.msk.f32.gmra.mrb[12].mxu0 %vm76_vm0, %v44_v31 }
  0x35   :  { %694 = vmatmul.mubr.msk.f32.gmra.mrb[12].mxu1 %vm76_vm0, %v44_v31  ;;  %207 = vmatprep.mubr.f32.mxu0 %v809_v0 }
  0x36   :  { %320 = vmatprep.mubr.f32.mxu1 %v809_v0 }
  0x38   :  { %687 = vmatmul.mubr.msk.f32.gmra.mrb[14].mxu0 %vm76_vm0, %v45_v32 }
  0x39   :  { %695 = vmatmul.mubr.msk.f32.gmra.mrb[14].mxu1 %vm76_vm0, %v45_v32  ;;  %453 = vmatprep.mubr.f32.mxu0 %v809_v0 }
  0x3a   :  { %566 = vmatprep.mubr.f32.mxu1 %v809_v0 }
  0x3c   :  { %696 = vmatmul.mubr.msk.f32.vlgmr.msra.gmra.mrb[16].mxu0 %vm76_vm0, %v891_v12 }
  0x3d   :  { %704 = vmatmul.mubr.msk.f32.vlgmr.msra.gmra.mrb[16].mxu1 %vm76_vm0, %v891_v12  ;;  %459 = vmatprep.mubr.f32.mxu0 %v809_v0 }
  0x3e   :  { %572 = vmatprep.mubr.f32.mxu1 %v809_v0 }
  0x40   :  { %697 = vmatmul.mubr.msk.f32.gmra.mrb[18].mxu0 %vm76_vm0, %v39_v26 }
  0x41   :  { %705 = vmatmul.mubr.msk.f32.gmra.mrb[18].mxu1 %vm76_vm0, %v39_v26  ;;  %465 = vmatprep.mubr.f32.mxu0 %v809_v0 }
  0x42   :  { %578 = vmatprep.mubr.f32.mxu1 %v809_v0 }
  0x44   :  { %698 = vmatmul.mubr.msk.f32.gmra.mrb[20].mxu0 %vm76_vm0, %v40_v27 }
  0x45   :  { %706 = vmatmul.mubr.msk.f32.gmra.mrb[20].mxu1 %vm76_vm0, %v40_v27  ;;  %471 = vmatprep.mubr.f32.mxu0 %v809_v0 }
  0x46   :  { %584 = vmatprep.mubr.f32.mxu1 %v809_v0 }
  0x48   :  { %699 = vmatmul.mubr.msk.f32.gmra.mrb[22].mxu0 %vm76_vm0, %v41_v28 }
  0x49   :  { %707 = vmatmul.mubr.msk.f32.gmra.mrb[22].mxu1 %vm76_vm0, %v41_v28  ;;  %477 = vmatprep.mubr.f32.mxu0 %v809_v0 }
  0x4a   :  { %590 = vmatprep.mubr.f32.mxu1 %v809_v0 }
  0x4c   :  { %700 = vmatmul.mubr.msk.f32.gmra.mrb[24].mxu0 %vm76_vm0, %v42_v29 }
  0x4d   :  { %708 = vmatmul.mubr.msk.f32.gmra.mrb[24].mxu1 %vm76_vm0, %v42_v29  ;;  %483 = vmatprep.mubr.f32.mxu0 %v809_v0 }
  0x4e   :  { %596 = vmatprep.mubr.f32.mxu1 %v809_v0 }
  0x50   :  { %701 = vmatmul.mubr.msk.f32.gmra.mrb[26].mxu0 %vm76_vm0, %v43_v30 }
  0x51   :  { %709 = vmatmul.mubr.msk.f32.gmra.mrb[26].mxu1 %vm76_vm0, %v43_v30  ;;  %489 = vmatprep.mubr.f32.mxu0 %v809_v0 }
  0x52   :  { %602 = vmatprep.mubr.f32.mxu1 %v809_v0 }
  0x54   :  { %702 = vmatmul.mubr.msk.f32.gmra.mrb[28].mxu0 %vm76_vm0, %v44_v31 }
  0x55   :  { %710 = vmatmul.mubr.msk.f32.gmra.mrb[28].mxu1 %vm76_vm0, %v44_v31  ;;  %495 = vmatprep.mubr.f32.mxu0 %v809_v0 }
  0x56   :  { %608 = vmatprep.mubr.f32.mxu1 %v809_v0 }
  0x58   :  { %703 = vmatmul.mubr.msk.f32.gmra.mrb[30].mxu0 %vm76_vm0, %v45_v32 }
  0x59   :  { %711 = vmatmul.mubr.msk.f32.gmra.mrb[30].mxu1 %vm76_vm0, %v45_v32 }
  0xef   :  { %v167_v44 = vpop.f32.mrb[0].mxu0 }
  0xf0   :  { %v168_v45 = vadd.f32 %v167_v44, %v991_v40  ;;  %v280_v46 = vpop.f32.mrb[0].mxu1  ;;  %v169_v47 = vpop.f32.mrb[1].mxu0  ;;  %v367_v44 = vld [vmem:[%s1122_s4] sm:$0xf]  ;;  %s756_s4 = scalar_lea.vmem %s653_s21, 4096 }
  0xf1   :  { %v281_v48 = vadd.f32 %v280_v46, %v995_v41  ;;  %v170_v49 = vadd.f32 %v169_v47, %v999_v42  ;;  %v282_v50 = vpop.f32.mrb[1].mxu1  ;;  %p757_p8 = scmp.ne.s32.totalorder %s653_s21, %s756_s4  ;;  %p762_p10 = scmp.lt.s32.totalorder %s756_s4, %s756_s4 }
  0xf2   :  { %327 = vst [vmem:[#allocation5] sm:$0xff] %v168_v45  ;;  %v283_v51 = vadd.f32 %v282_v50, %v1003_v43  ;;  %v1039_v50 = vrot.slane %v367_v44, %v58_v35  ;;  %v1054_v35 = vrot.slane %v367_v44, %v70_v39 }
  0xf3   :  { %329 = vst [vmem:[#allocation5 + $0x10] sm:$0xff] %v281_v48  ;;  %328 = vst [vmem:[#allocation5 + $0x8] sm:$0xff] %v170_v49  ;;  %v173_v52 = vpop.f32.mrb[2].mxu0  ;;  %p763_p11 = por %p762_p10, %p761_p9 }
  0xf4   :  { %330 = vst [vmem:[#allocation5 + $0x18] sm:$0xff] %v283_v51  ;;  %v174_v53 = vadd.f32 %v173_v52, %v991_v40  ;;  %v286_v54 = vpop.f32.mrb[2].mxu1  ;;  %v175_v55 = vpop.f32.mrb[3].mxu0 }
  0xf5   :  { %v287_v56 = vadd.f32 %v286_v54, %v995_v41  ;;  %v176_v57 = vadd.f32 %v175_v55, %v999_v42  ;;  %v288_v58 = vpop.f32.mrb[3].mxu1  ;;  %v1045_v54 = vrot.slane %v367_v44, %v66_v37  ;;  %v1049_v55 = vrot.slane %v367_v44, %v62_v38  ;;  %p764_p12 = pnand %p763_p11, %p757_p8 }
  0xf6   :  { %331 = vst [vmem:[#allocation5 + $0x20] sm:$0xff] %v174_v53  ;;  %v289_v59 = vadd.f32 %v288_v58, %v1003_v43 }
  0xf7   :  { %333 = vst [vmem:[#allocation5 + $0x30] sm:$0xff] %v287_v56  ;;  %332 = vst [vmem:[#allocation5 + $0x28] sm:$0xff] %v176_v57  ;;  %v179_v60 = vpop.f32.mrb[4].mxu0 }
  0xf8   :  { %334 = vst [vmem:[#allocation5 + $0x38] sm:$0xff] %v289_v59  ;;  %v180_v61 = vadd.f32 %v179_v60, %v991_v40  ;;  %v292_v62 = vpop.f32.mrb[4].mxu1  ;;  %v181_v63 = vpop.f32.mrb[5].mxu0 }
  0xf9   :  { %v293_v0 = vadd.f32 %v292_v62, %v995_v41  ;;  %v182_v1 = vadd.f32 %v181_v63, %v999_v42  ;;  %v294_v2 = vpop.f32.mrb[5].mxu1 }
  0xfa   :  { %335 = vst [vmem:[#allocation5 + $0x40] sm:$0xff] %v180_v61  ;;  %v295_v3 = vadd.f32 %v294_v2, %v1003_v43 }
  0xfb   :  { %337 = vst [vmem:[#allocation5 + $0x50] sm:$0xff] %v293_v0  ;;  %336 = vst [vmem:[#allocation5 + $0x48] sm:$0xff] %v182_v1  ;;  %v185_v4 = vpop.f32.mrb[6].mxu0 }
  0xfc   :  { %338 = vst [vmem:[#allocation5 + $0x58] sm:$0xff] %v295_v3  ;;  %v186_v5 = vadd.f32 %v185_v4, %v991_v40  ;;  %v298_v6 = vpop.f32.mrb[6].mxu1  ;;  %v187_v7 = vpop.f32.mrb[7].mxu0 }
  0xfd   :  { %v299_v8 = vadd.f32 %v298_v6, %v995_v41  ;;  %v188_v9 = vadd.f32 %v187_v7, %v999_v42  ;;  %v300_v10 = vpop.f32.mrb[7].mxu1 }
  0xfe   :  { %339 = vst [vmem:[#allocation5 + $0x60] sm:$0xff] %v186_v5  ;;  %v301_v11 = vadd.f32 %v300_v10, %v1003_v43 }
  0xff   :  { %341 = vst [vmem:[#allocation5 + $0x70] sm:$0xff] %v299_v8  ;;  %340 = vst [vmem:[#allocation5 + $0x68] sm:$0xff] %v188_v9  ;;  %v191_v12 = vpop.f32.mrb[8].mxu0 }
 0x100   :  { %342 = vst [vmem:[#allocation5 + $0x78] sm:$0xff] %v301_v11  ;;  %v192_v13 = vadd.f32 %v191_v12, %v991_v40  ;;  %v304_v14 = vpop.f32.mrb[8].mxu1  ;;  %v193_v15 = vpop.f32.mrb[9].mxu0 }
 0x101   :  { %v305_v16 = vadd.f32 %v304_v14, %v995_v41  ;;  %v194_v17 = vadd.f32 %v193_v15, %v999_v42  ;;  %v306_v18 = vpop.f32.mrb[9].mxu1 }
 0x102   :  { %343 = vst [vmem:[#allocation5 + $0x80] sm:$0xff] %v192_v13  ;;  %v307_v19 = vadd.f32 %v306_v18, %v1003_v43 }
 0x103   :  { %345 = vst [vmem:[#allocation5 + $0x90] sm:$0xff] %v305_v16  ;;  %344 = vst [vmem:[#allocation5 + $0x88] sm:$0xff] %v194_v17  ;;  %v197_v20 = vpop.f32.mrb[10].mxu0 }
 0x104   :  { %346 = vst [vmem:[#allocation5 + $0x98] sm:$0xff] %v307_v19  ;;  %v198_v21 = vadd.f32 %v197_v20, %v991_v40  ;;  %v310_v22 = vpop.f32.mrb[10].mxu1  ;;  %v199_v23 = vpop.f32.mrb[11].mxu0 }
 0x105   :  { %v311_v24 = vadd.f32 %v310_v22, %v995_v41  ;;  %v200_v25 = vadd.f32 %v199_v23, %v999_v42  ;;  %v312_v26 = vpop.f32.mrb[11].mxu1 }
 0x106   :  { %347 = vst [vmem:[#allocation5 + $0xa0] sm:$0xff] %v198_v21  ;;  %v313_v27 = vadd.f32 %v312_v26, %v1003_v43 }
 0x107   :  { %349 = vst [vmem:[#allocation5 + $0xb0] sm:$0xff] %v311_v24  ;;  %348 = vst [vmem:[#allocation5 + $0xa8] sm:$0xff] %v200_v25  ;;  %v203_v28 = vpop.f32.mrb[12].mxu0 }
 0x108   :  { %350 = vst [vmem:[#allocation5 + $0xb8] sm:$0xff] %v313_v27  ;;  %v204_v29 = vadd.f32 %v203_v28, %v991_v40  ;;  %v316_v30 = vpop.f32.mrb[12].mxu1  ;;  %v205_v31 = vpop.f32.mrb[13].mxu0 }
 0x109   :  { %v317_v32 = vadd.f32 %v316_v30, %v995_v41  ;;  %v206_v33 = vadd.f32 %v205_v31, %v999_v42  ;;  %v318_v36 = vpop.f32.mrb[13].mxu1 }
 0x10a   :  { %351 = vst [vmem:[#allocation5 + $0xc0] sm:$0xff] %v204_v29  ;;  %v319_v45 = vadd.f32 %v318_v36, %v1003_v43 }
 0x10b   :  { %353 = vst [vmem:[#allocation5 + $0xd0] sm:$0xff] %v317_v32  ;;  %352 = vst [vmem:[#allocation5 + $0xc8] sm:$0xff] %v206_v33  ;;  %v209_v46 = vpop.f32.mrb[14].mxu0 }
 0x10c   :  { %354 = vst [vmem:[#allocation5 + $0xd8] sm:$0xff] %v319_v45  ;;  %v210_v47 = vadd.f32 %v209_v46, %v991_v40  ;;  %v322_v48 = vpop.f32.mrb[14].mxu1  ;;  %v211_v49 = vpop.f32.mrb[15].mxu0 }
 0x10d   :  { %v323_v51 = vadd.f32 %v322_v48, %v995_v41  ;;  %v212_v52 = vadd.f32 %v211_v49, %v999_v42  ;;  %v324_v53 = vpop.f32.mrb[15].mxu1 }
 0x10e   :  { %355 = vst [vmem:[#allocation5 + $0xe0] sm:$0xff] %v210_v47  ;;  %v325_v40 = vadd.f32 %v324_v53, %v1003_v43 }
 0x10f   :  { %357 = vst [vmem:[#allocation5 + $0xf0] sm:$0xff] %v323_v51  ;;  %356 = vst [vmem:[#allocation5 + $0xe8] sm:$0xff] %v212_v52  ;;  %v455_v41 = vpop.f32.mrb[16].mxu0 }
 0x110   :  { %358 = vst [vmem:[#allocation5 + $0xf8] sm:$0xff] %v325_v40  ;;  %v456_v42 = vadd.f32 %v455_v41, %v1039_v50  ;;  %v568_v37 = vpop.f32.mrb[16].mxu1  ;;  %v457_v56 = vpop.f32.mrb[17].mxu0 }
 0x111   :  { %v569_v57 = vadd.f32 %v568_v37, %v1045_v54  ;;  %v458_v38 = vadd.f32 %v457_v56, %v1049_v55  ;;  %v570_v58 = vpop.f32.mrb[17].mxu1 }
 0x112   :  { %767 = shalt.err (!%p764_p12)
}
 0x113   :  { %s768_s24 = scalar_lea.hbm %s1123_s5, 4096 }
 0x114   :  { %p769_p13 = scmp.ne.s32.totalorder %s1123_s5, %s768_s24  ;;  %p772_p0 = scmp.lt.u32.totalorder %s768_s24, %s1123_s5 }
 0x116   :  { %p774_p1 = pnand %p772_p0, %p769_p13 }
 0x118   :  { %777 = shalt.err (!%p774_p1)
}
 0x119   :  { %658 = dma.vmem_to_hbm [thread:$0]  %s653_s21, 4096, %s1123_s5, [#allocation4], %s807_s7, %s807_s7, %s808_s8   ;;  %615 = vst [vmem:[#allocation6] sm:$0xff] %v456_v42  ;;  %v571_v34 = vadd.f32 %v570_v58, %v1054_v35  ;;  %617 = vst [vmem:[#allocation6 + $0x10] sm:$0xff] %v569_v57  ;;  %v461_v39 = vpop.f32.mrb[18].mxu0  ;;  %v574_v59 = vpop.f32.mrb[18].mxu1 }
 0x11a   :  { %616 = vst [vmem:[#allocation6 + $0x8] sm:$0xff] %v458_v38  ;;  %v462_v43 = vadd.f32 %v461_v39, %v1039_v50  ;;  %v463_v60 = vpop.f32.mrb[19].mxu0  ;;  %v575_v61 = vadd.f32 %v574_v59, %v1045_v54  ;;  %v576_v63 = vpop.f32.mrb[19].mxu1  ;;  %s811_s5 = smov [#allocation6]  }
 0x11b   :  { %618 = vst [vmem:[#allocation6 + $0x18] sm:$0xff] %v571_v34  ;;  %v464_v62 = vadd.f32 %v463_v60, %v1049_v55  ;;  %v577_v0 = vadd.f32 %v576_v63, %v1054_v35  ;;  %v467_v1 = vpop.f32.mrb[20].mxu0  ;;  %v580_v3 = vpop.f32.mrb[20].mxu1  ;;  %s664_s30 = sshll.u32 %s811_s5, 4  ;;  %s665_s30 = int_to_ptr.vmem [resolvable:$true] %s664_s30 }
 0x11c   :  { %619 = vst [vmem:[#allocation6 + $0x20] sm:$0xff] %v462_v43  ;;  %621 = vst [vmem:[#allocation6 + $0x30] sm:$0xff] %v575_v61  ;;  %v468_v2 = vadd.f32 %v467_v1, %v1039_v50  ;;  %v469_v4 = vpop.f32.mrb[21].mxu0  ;;  %v581_v5 = vadd.f32 %v580_v3, %v1045_v54  ;;  %v582_v7 = vpop.f32.mrb[21].mxu1  ;;  %s778_s9 = scalar_lea.vmem %s665_s30, 4096  ;;  %p783_p3 = scmp.lt.s32.totalorder %s665_s30, %s665_s30 }
 0x11d   :  { %620 = vst [vmem:[#allocation6 + $0x28] sm:$0xff] %v464_v62  ;;  %622 = vst [vmem:[#allocation6 + $0x38] sm:$0xff] %v577_v0  ;;  %v470_v6 = vadd.f32 %v469_v4, %v1049_v55  ;;  %v583_v8 = vadd.f32 %v582_v7, %v1054_v35  ;;  %v473_v9 = vpop.f32.mrb[22].mxu0  ;;  %v586_v11 = vpop.f32.mrb[22].mxu1  ;;  %p779_p2 = scmp.ne.s32.totalorder %s665_s30, %s778_s9  ;;  %p784_p4 = scmp.lt.s32.totalorder %s778_s9, %s778_s9 }
 0x11e   :  { %623 = vst [vmem:[#allocation6 + $0x40] sm:$0xff] %v468_v2  ;;  %625 = vst [vmem:[#allocation6 + $0x50] sm:$0xff] %v581_v5  ;;  %v474_v10 = vadd.f32 %v473_v9, %v1039_v50  ;;  %v475_v12 = vpop.f32.mrb[23].mxu0  ;;  %v587_v13 = vadd.f32 %v586_v11, %v1045_v54  ;;  %v588_v15 = vpop.f32.mrb[23].mxu1 }
 0x11f   :  { %624 = vst [vmem:[#allocation6 + $0x48] sm:$0xff] %v470_v6  ;;  %626 = vst [vmem:[#allocation6 + $0x58] sm:$0xff] %v583_v8  ;;  %v476_v14 = vadd.f32 %v475_v12, %v1049_v55  ;;  %v589_v16 = vadd.f32 %v588_v15, %v1054_v35  ;;  %v479_v17 = vpop.f32.mrb[24].mxu0  ;;  %p785_p5 = por %p784_p4, %p783_p3 }
 0x120   :  { %627 = vst [vmem:[#allocation6 + $0x60] sm:$0xff] %v474_v10  ;;  %629 = vst [vmem:[#allocation6 + $0x70] sm:$0xff] %v587_v13  ;;  %v480_v18 = vadd.f32 %v479_v17, %v1039_v50  ;;  %v592_v19 = vpop.f32.mrb[24].mxu1  ;;  %v481_v20 = vpop.f32.mrb[25].mxu0 }
 0x121   :  { %628 = vst [vmem:[#allocation6 + $0x68] sm:$0xff] %v476_v14  ;;  %630 = vst [vmem:[#allocation6 + $0x78] sm:$0xff] %v589_v16  ;;  %v593_v21 = vadd.f32 %v592_v19, %v1045_v54  ;;  %v482_v22 = vadd.f32 %v481_v20, %v1049_v55  ;;  %v594_v23 = vpop.f32.mrb[25].mxu1  ;;  %p786_p6 = pnand %p785_p5, %p779_p2 }
 0x122   :  { %631 = vst [vmem:[#allocation6 + $0x80] sm:$0xff] %v480_v18  ;;  %v595_v24 = vadd.f32 %v594_v23, %v1054_v35 }
 0x123   :  { %633 = vst [vmem:[#allocation6 + $0x90] sm:$0xff] %v593_v21  ;;  %632 = vst [vmem:[#allocation6 + $0x88] sm:$0xff] %v482_v22  ;;  %v485_v25 = vpop.f32.mrb[26].mxu0 }
 0x124   :  { %634 = vst [vmem:[#allocation6 + $0x98] sm:$0xff] %v595_v24  ;;  %v486_v26 = vadd.f32 %v485_v25, %v1039_v50  ;;  %v598_v27 = vpop.f32.mrb[26].mxu1  ;;  %v487_v28 = vpop.f32.mrb[27].mxu0 }
 0x125   :  { %v599_v29 = vadd.f32 %v598_v27, %v1045_v54  ;;  %v488_v30 = vadd.f32 %v487_v28, %v1049_v55  ;;  %v600_v31 = vpop.f32.mrb[27].mxu1 }
 0x126   :  { %635 = vst [vmem:[#allocation6 + $0xa0] sm:$0xff] %v486_v26  ;;  %v601_v32 = vadd.f32 %v600_v31, %v1054_v35 }
 0x127   :  { %637 = vst [vmem:[#allocation6 + $0xb0] sm:$0xff] %v599_v29  ;;  %636 = vst [vmem:[#allocation6 + $0xa8] sm:$0xff] %v488_v30  ;;  %v491_v33 = vpop.f32.mrb[28].mxu0 }
 0x128   :  { %638 = vst [vmem:[#allocation6 + $0xb8] sm:$0xff] %v601_v32  ;;  %v492_v36 = vadd.f32 %v491_v33, %v1039_v50  ;;  %v604_v44 = vpop.f32.mrb[28].mxu1  ;;  %v493_v45 = vpop.f32.mrb[29].mxu0 }
 0x129   :  { %v605_v46 = vadd.f32 %v604_v44, %v1045_v54  ;;  %v494_v47 = vadd.f32 %v493_v45, %v1049_v55  ;;  %v606_v48 = vpop.f32.mrb[29].mxu1 }
 0x12a   :  { %639 = vst [vmem:[#allocation6 + $0xc0] sm:$0xff] %v492_v36  ;;  %v607_v49 = vadd.f32 %v606_v48, %v1054_v35 }
 0x12b   :  { %641 = vst [vmem:[#allocation6 + $0xd0] sm:$0xff] %v605_v46  ;;  %640 = vst [vmem:[#allocation6 + $0xc8] sm:$0xff] %v494_v47  ;;  %v497_v51 = vpop.f32.mrb[30].mxu0 }
 0x12c   :  { %642 = vst [vmem:[#allocation6 + $0xd8] sm:$0xff] %v607_v49  ;;  %v498_v52 = vadd.f32 %v497_v51, %v1039_v50  ;;  %v610_v53 = vpop.f32.mrb[30].mxu1  ;;  %v499_v40 = vpop.f32.mrb[31].mxu0 }
 0x12d   :  { %v611_v41 = vadd.f32 %v610_v53, %v1045_v54  ;;  %v500_v42 = vadd.f32 %v499_v40, %v1049_v55  ;;  %v612_v37 = vpop.f32.mrb[31].mxu1 }
 0x12e   :  { %643 = vst [vmem:[#allocation6 + $0xe0] sm:$0xff] %v498_v52  ;;  %v613_v56 = vadd.f32 %v612_v37, %v1054_v35 }
 0x12f   :  { %645 = vst [vmem:[#allocation6 + $0xf0] sm:$0xff] %v611_v41  ;;  %644 = vst [vmem:[#allocation6 + $0xe8] sm:$0xff] %v500_v42 }
 0x130   :  { %646 = vst [vmem:[#allocation6 + $0xf8] sm:$0xff] %v613_v56 }
 0x131   :  { %789 = shalt.err (!%p786_p6)
}
 0x132   :  { %s790_s12 = scalar_lea.hbm %s1124_s6, 4096 }
 0x133   :  { %p791_p7 = scmp.ne.s32.totalorder %s1124_s6, %s790_s12  ;;  %p794_p8 = scmp.lt.u32.totalorder %s790_s12, %s1124_s6 }
 0x135   :  { %p796_p9 = pnand %p794_p8, %p791_p7 }
 0x137   :  { %799 = shalt.err (!%p796_p9)
}
 0x138   :  { %670 = dma.vmem_to_hbm [thread:$0]  %s665_s30, 4096, %s1124_s6, [#allocation7], %s807_s7, %s807_s7, %s808_s8  }
 0x139   :  { %802 = dma.done.wait [#allocation4], 4096  }
 0x13a   :  { %803 = vsyncadd [#allocation4], 4294963200 }
 0x13b   :  { %804 = dma.done.wait [#allocation7], 4096  }
 0x13c   :  { %805 = vsyncadd [#allocation7], 4294963200 }
 0x13d   :  { %677 = vsyncpa [#allocation3], 1 }
 0x13e   :  { %678 = vsyncpa [#allocation4], 1 }
 0x13f   :  { %679 = vsyncpa [#allocation7], 1 }

</bundles_post_ra>
